<compile_context>
chip_gen: v5e
topology: v5e:2x2
jax: 0.10.0
libtpu: 0.0.40
codegen_flags: <defaults>
</compile_context>

<pallas_src>
import functools

import jax
import jax.numpy as jnp
from jax.experimental import pallas as pl
from jax.experimental.pallas import tpu as pltpu

BN_EPS = 1e-5

_LANE = 128           # lane width (last-dim alignment)
_HIDDEN_ALIGN = 256   # MXU systolic dim on v6e/v7x (128 would suffice on v5e)
_SUBLANE = 16         # bf16 sublane packing for the row (batch) dimension
_MAX_ROW_TILE = 256   # rows per grid step; keeps (tile,H) f32 scratch modest on v7x 64MiB VMEM
_VMEM_LIMIT = 56 * 1024 * 1024


def _round_up(x, m):
    return (x + m - 1) // m * m


# --------------------------------------------------------------------------- #
# Pass 1: accumulate full-batch sum / sum-of-squares of the hidden pre-activation
# --------------------------------------------------------------------------- #
def _bn_stats_kernel(x_ref, w1_ref, b1_ref, stats_ref, *, n_valid, tile_n):
    i = pl.program_id(0)

    @pl.when(i == 0)
    def _():
        stats_ref[...] = jnp.zeros_like(stats_ref)

    # hidden pre-activation for this row tile (bf16 operands, f32 MXU accumulation)
    h = jnp.dot(x_ref[...], w1_ref[...], preferred_element_type=jnp.float32) + b1_ref[...]

    # mask padded batch rows (they would otherwise contribute the bias to the stats)
    row = i * tile_n + jax.lax.broadcasted_iota(jnp.int32, h.shape, 0)
    h = jnp.where(row < n_valid, h, 0.0)

    stats_ref[0:1, :] += jnp.sum(h, axis=0, keepdims=True)
    stats_ref[1:2, :] += jnp.sum(h * h, axis=0, keepdims=True)


# --------------------------------------------------------------------------- #
# Pass 2: Linear -> folded BatchNorm (scale, shift) -> ReLU -> Linear
# --------------------------------------------------------------------------- #
def _mlp_kernel(x_ref, w1_ref, b1_ref, scale_ref, shift_ref, w2_ref, b2_ref,
                out_ref, h_scratch):
    # Linear 1 into explicit VMEM scratch (f32 accumulation)
    h_scratch[...] = (
        jnp.dot(x_ref[...], w1_ref[...], preferred_element_type=jnp.float32)
        + b1_ref[...]
    )
    # BatchNorm folded to scale/shift (full-batch stats), then ReLU, all in f32
    h = jnp.maximum(h_scratch[...] * scale_ref[...] + shift_ref[...], 0.0)
    # Linear 2 (bf16 operands, f32 accumulation), lane-dense padded output
    out_ref[...] = (
        jnp.dot(h.astype(w2_ref.dtype), w2_ref[...],
                preferred_element_type=jnp.float32)
        + b2_ref[...]
    ).astype(out_ref.dtype)


# --------------------------------------------------------------------------- #
# Wrapper
# --------------------------------------------------------------------------- #
def mlp1hidden_forward(x, w1, b1, gamma, beta, w2, b2, *, row_tile=None):
    """x: (N, F) float. w1: (F, H), w2: (H, O) pre-transposed. Returns (N, O) float32."""
    n, f = x.shape
    h_dim = w1.shape[1]
    o = w2.shape[1]

    f_pad = _round_up(f, _LANE)
    h_pad = _round_up(h_dim, _HIDDEN_ALIGN)
    o_pad = _round_up(o, _LANE)
    if row_tile is None:
        tile_n = min(_MAX_ROW_TILE, _round_up(n, _SUBLANE))
    else:
        tile_n = _round_up(row_tile, _SUBLANE)
    n_pad = _round_up(n, tile_n)
    n_tiles = n_pad // tile_n

    # Pad + cast: bf16 matmul operands, f32 bias/BN params.
    x_p = jnp.pad(x, ((0, n_pad - n), (0, f_pad - f))).astype(jnp.bfloat16)
    w1_p = jnp.pad(w1, ((0, f_pad - f), (0, h_pad - h_dim))).astype(jnp.bfloat16)
    w2_p = jnp.pad(w2, ((0, h_pad - h_dim), (0, o_pad - o))).astype(jnp.bfloat16)
    b1_p = jnp.pad(b1, ((0, 0), (0, h_pad - h_dim))).astype(jnp.float32)
    gamma_p = jnp.pad(gamma, ((0, 0), (0, h_pad - h_dim))).astype(jnp.float32)
    beta_p = jnp.pad(beta, ((0, 0), (0, h_pad - h_dim))).astype(jnp.float32)
    b2_p = jnp.pad(b2, ((0, 0), (0, o_pad - o))).astype(jnp.float32)

    resident = lambda i: (0, 0)        # weights / params stay in VMEM across the grid
    rows = lambda i: (i, 0)            # row-tiled activations

    # ---- pass 1: full-batch sum / sum-of-squares of h = x @ W1 + b1 ----
    stats = pl.pallas_call(
        functools.partial(_bn_stats_kernel, n_valid=n, tile_n=tile_n),
        out_shape=jax.ShapeDtypeStruct((2, h_pad), jnp.float32),
        grid_spec=pltpu.PrefetchScalarGridSpec(
            num_scalar_prefetch=0,
            grid=(n_tiles,),
            in_specs=[
                pl.BlockSpec((tile_n, f_pad), rows),
                pl.BlockSpec((f_pad, h_pad), resident),
                pl.BlockSpec((1, h_pad), resident),
            ],
            out_specs=pl.BlockSpec((2, h_pad), resident),
        ),
        compiler_params=pltpu.CompilerParams(
            dimension_semantics=("arbitrary",),      # output is an accumulator
            vmem_limit_bytes=_VMEM_LIMIT,
        ),
    )(x_p, w1_p, b1_p)

    # ---- fold BatchNorm (training-mode batch stats, biased var) into scale/shift ----
    mean = stats[0:1, :] / n
    var = jnp.maximum(stats[1:2, :] / n - mean * mean, 0.0)
    scale = gamma_p * jax.lax.rsqrt(var + BN_EPS)
    shift = beta_p - mean * scale

    # ---- pass 2: row-tiled, pipelined, megacore-parallel main kernel ----
    out_p = pl.pallas_call(
        _mlp_kernel,
        out_shape=jax.ShapeDtypeStruct((n_pad, o_pad), jnp.float32),
        grid_spec=pltpu.PrefetchScalarGridSpec(
            num_scalar_prefetch=0,
            grid=(n_tiles,),
            in_specs=[
                pl.BlockSpec((tile_n, f_pad), rows),
                pl.BlockSpec((f_pad, h_pad), resident),
                pl.BlockSpec((1, h_pad), resident),
                pl.BlockSpec((1, h_pad), resident),
                pl.BlockSpec((1, h_pad), resident),
                pl.BlockSpec((h_pad, o_pad), resident),
                pl.BlockSpec((1, o_pad), resident),
            ],
            out_specs=pl.BlockSpec((tile_n, o_pad), rows),
            scratch_shapes=[pltpu.VMEM((tile_n, h_pad), jnp.float32)],
        ),
        compiler_params=pltpu.CompilerParams(
            dimension_semantics=("parallel",),       # independent row tiles -> both TCs on v7x
            vmem_limit_bytes=_VMEM_LIMIT,
        ),
    )(x_p, w1_p, b1_p, scale, shift, w2_p, b2_p)

    return out_p[:n, :o]


def init_params(key, num_input_features, hidden_units, num_out_features):
    """Deterministic PyTorch-style Linear init (U(-1/sqrt(fan_in), 1/sqrt(fan_in)))."""
    k1, k2, k3, k4 = jax.random.split(key, 4)
    bound1 = 1.0 / jnp.sqrt(num_input_features)
    bound2 = 1.0 / jnp.sqrt(hidden_units)
    # stored as (in, out) so the kernel computes x @ W directly on the MXU
    w1 = jax.random.uniform(k1, (num_input_features, hidden_units),
                            jnp.float32, -bound1, bound1)
    b1 = jax.random.uniform(k2, (1, hidden_units), jnp.float32, -bound1, bound1)
    w2 = jax.random.uniform(k3, (hidden_units, num_out_features),
                            jnp.float32, -bound2, bound2)
    b2 = jax.random.uniform(k4, (1, num_out_features), jnp.float32, -bound2, bound2)
    # BatchNorm1d affine params at init: gamma=1, beta=0
    gamma = jnp.ones((1, hidden_units), jnp.float32)
    beta = jnp.zeros((1, hidden_units), jnp.float32)
    return w1, b1, gamma, beta, w2, b2


if __name__ == "__main__":
    NUM_IN, HIDDEN, NUM_OUT, BATCH = 16, 32, 8, 40   # BATCH=40 + row_tile=16 -> 3 row tiles

    key = jax.random.PRNGKey(0)
    kx, kp = jax.random.split(key)
    x = jax.random.normal(kx, (BATCH, NUM_IN), jnp.float32)
    params = init_params(kp, NUM_IN, HIDDEN, NUM_OUT)

    out = mlp1hidden_forward(x, *params, row_tile=16)
    jax.block_until_ready(out)

    # Pure-JAX reference with matching numerics (bf16 MXU operands, f32 accumulation).
    w1, b1, gamma, beta, w2, b2 = params
    xb, w1b, w2b = (a.astype(jnp.bfloat16) for a in (x, w1, w2))
    h = jnp.dot(xb, w1b, preferred_element_type=jnp.float32) + b1
    mu = h.mean(axis=0, keepdims=True)
    var = ((h - mu) ** 2).mean(axis=0, keepdims=True)
    h = (h - mu) * jax.lax.rsqrt(var + BN_EPS) * gamma + beta
    h = jnp.maximum(h, 0.0)
    ref = jnp.dot(h.astype(jnp.bfloat16), w2b, preferred_element_type=jnp.float32) + b2

    assert out.shape == (BATCH, NUM_OUT)
    assert jnp.allclose(out, ref, atol=1e-3, rtol=1e-3), float(jnp.max(jnp.abs(out - ref)))

    print("KERNEL_OK")
</pallas_src>

<mosaic_0001>
module attributes {stable_mosaic.version = 11 : i64} {
  func.func @_bn_stats_kernel(%arg0: i32, %arg1: memref<16x128xbf16, #tpu.memory_space<vmem>>, %arg2: memref<128x256xbf16, #tpu.memory_space<vmem>>, %arg3: memref<1x256xf32, #tpu.memory_space<vmem>>, %arg4: memref<2x256xf32, #tpu.memory_space<vmem>>) attributes {dimension_semantics = [#tpu.dimension_semantics<arbitrary>], iteration_bounds = array<i64: 3>, scalar_prefetch = 0 : i64, scratch_operands = 0 : i64, tpu.core_type = #tpu.core_type<tc>, window_params = [{transform_indices = @transform_0, window_bounds = array<i64: 16, 128>}, {pipeline_mode = #tpu.pipeline_mode<synchronous>, transform_indices = @transform_1, window_bounds = array<i64: 128, 256>}, {pipeline_mode = #tpu.pipeline_mode<synchronous>, transform_indices = @transform_2, window_bounds = array<i64: 1, 256>}, {pipeline_mode = #tpu.pipeline_mode<synchronous>, transform_indices = @transform_3, window_bounds = array<i64: 2, 256>}]} {
    %c0_i32 = arith.constant 0 : i32
    %0 = arith.cmpi eq, %arg0, %c0_i32 : i32
    %1 = arith.extui %0 : i1 to i32
    %c0_i32_0 = arith.constant 0 : i32
    %2 = arith.cmpi ne, %1, %c0_i32_0 : i32
    scf.if %2 {
      %cst_16 = arith.constant 0.000000e+00 : f32
      %28 = vector.broadcast %cst_16 : f32 to vector<2x256xf32>
      %c0_17 = arith.constant 0 : index
      %c0_18 = arith.constant 0 : index
      %29 = vector.load %arg4[%c0_17, %c0_18] : memref<2x256xf32, #tpu.memory_space<vmem>>, vector<2x256xf32>
      tpu.vector_store %arg4[%c0_17, %c0_18], %28 {strides = array<i32>} : memref<2x256xf32, #tpu.memory_space<vmem>>, vector<2x256xf32>,
    } else {
    }
    %c0 = arith.constant 0 : index
    %c0_1 = arith.constant 0 : index
    %3 = vector.load %arg1[%c0, %c0_1] : memref<16x128xbf16, #tpu.memory_space<vmem>>, vector<16x128xbf16>
    %c0_2 = arith.constant 0 : index
    %c0_3 = arith.constant 0 : index
    %4 = vector.load %arg2[%c0_2, %c0_3] : memref<128x256xbf16, #tpu.memory_space<vmem>>, vector<128x256xbf16>
    %cst = arith.constant dense<0.000000e+00> : vector<16x256xf32>
    %5 = tpu.matmul %3, %4, %cst {dimension_numbers = #tpu.dot_dimension_numbers<[1], [0], [0], [1], [0, 0, 1, 1], [], []>} : vector<16x128xbf16>, vector<128x256xbf16>, vector<16x256xf32> -> vector<16x256xf32>
    %c0_4 = arith.constant 0 : index
    %c0_5 = arith.constant 0 : index
    %6 = vector.load %arg3[%c0_4, %c0_5] : memref<1x256xf32, #tpu.memory_space<vmem>>, vector<1x256xf32>
    %7 = vector.broadcast %6 : vector<1x256xf32> to vector<16x256xf32>
    %8 = arith.addf %5, %7 : vector<16x256xf32>
    %c16_i32 = arith.constant 16 : i32
    %9 = arith.muli %arg0, %c16_i32 : i32
    %10 = tpu.iota {dimensions = array<i32: 0>} : vector<16x256xi32>
    %11 = vector.broadcast %9 : i32 to vector<16x256xi32>
    %12 = arith.addi %11, %10 : vector<16x256xi32>
    %c40_i32 = arith.constant 40 : i32
    %13 = vector.broadcast %c40_i32 : i32 to vector<16x256xi32>
    %14 = arith.cmpi slt, %12, %13 : vector<16x256xi32>
    %cst_6 = arith.constant 0.000000e+00 : f32
    %15 = vector.broadcast %cst_6 : f32 to vector<16x256xf32>
    %16 = arith.select %14, %8, %15 : vector<16x256xi1>, vector<16x256xf32>
    %c0_7 = arith.constant 0 : index
    %c0_8 = arith.constant 0 : index
    %17 = vector.load %arg4[%c0_7, %c0_8] : memref<2x256xf32, #tpu.memory_space<vmem>>, vector<1x256xf32>
    %cst_9 = arith.constant dense<0.000000e+00> : vector<256xf32>
    %18 = vector.multi_reduction <add>, %16, %cst_9 [0] : vector<16x256xf32> to vector<256xf32>
    %19 = vector.shape_cast %18 : vector<256xf32> to vector<1x256xf32>
    %20 = arith.addf %17, %19 : vector<1x256xf32>
    %c0_10 = arith.constant 0 : index
    %c0_11 = arith.constant 0 : index
    %21 = vector.load %arg4[%c0_10, %c0_11] : memref<2x256xf32, #tpu.memory_space<vmem>>, vector<1x256xf32>
    tpu.vector_store %arg4[%c0_10, %c0_11], %20 {strides = array<i32>} : memref<2x256xf32, #tpu.memory_space<vmem>>, vector<1x256xf32>,
    %c1 = arith.constant 1 : index
    %c0_12 = arith.constant 0 : index
    %22 = vector.load %arg4[%c1, %c0_12] : memref<2x256xf32, #tpu.memory_space<vmem>>, vector<1x256xf32>
    %23 = arith.mulf %16, %16 : vector<16x256xf32>
    %cst_13 = arith.constant dense<0.000000e+00> : vector<256xf32>
    %24 = vector.multi_reduction <add>, %23, %cst_13 [0] : vector<16x256xf32> to vector<256xf32>
    %25 = vector.shape_cast %24 : vector<256xf32> to vector<1x256xf32>
    %26 = arith.addf %22, %25 : vector<1x256xf32>
    %c1_14 = arith.constant 1 : index
    %c0_15 = arith.constant 0 : index
    %27 = vector.load %arg4[%c1_14, %c0_15] : memref<2x256xf32, #tpu.memory_space<vmem>>, vector<1x256xf32>
    tpu.vector_store %arg4[%c1_14, %c0_15], %26 {strides = array<i32>} : memref<2x256xf32, #tpu.memory_space<vmem>>, vector<1x256xf32>,
    return
  }
  func.func @transform_0(%arg0: i32) -> (i32, i32) {
    %c0_i32 = arith.constant 0 : i32
    %c0_i32_0 = arith.constant 0 : i32
    return %arg0, %c0_i32 : i32, i32
  }
  func.func @transform_1(%arg0: i32) -> (i32, i32) {
    %c0_i32 = arith.constant 0 : i32
    %c0_i32_0 = arith.constant 0 : i32
    %c0_i32_1 = arith.constant 0 : i32
    return %c0_i32, %c0_i32_0 : i32, i32
  }
  func.func @transform_2(%arg0: i32) -> (i32, i32) {
    %c0_i32 = arith.constant 0 : i32
    %c0_i32_0 = arith.constant 0 : i32
    %c0_i32_1 = arith.constant 0 : i32
    return %c0_i32, %c0_i32_0 : i32, i32
  }
  func.func @transform_3(%arg0: i32) -> (i32, i32) {
    %c0_i32 = arith.constant 0 : i32
    %c0_i32_0 = arith.constant 0 : i32
    %c0_i32_1 = arith.constant 0 : i32
    return %c0_i32, %c0_i32_0 : i32, i32
  }
}

</mosaic_0001>

<bundles_post_ra>
// kernel: tpu_custom_call.1
= control target key start
LH: loop header
LB: loop body
LE: loop exit
PB: predicated region body
PF: predicated region fallthrough
CT: control target
= control target key end

     0   :  { %8 = vsyncpa [#allocation3], 0  ;;  %s981_s0 = inlined_call_operand.hbm [shape: bf16[48,128], index: 0, kind: input, shape index: {}]   ;;  %s982_s1 = inlined_call_operand.hbm [shape: bf16[128,256], index: 1, kind: input, shape index: {}]   ;;  %s983_s2 = inlined_call_operand.hbm [shape: f32[1,256], index: 2, kind: input, shape index: {}]   ;;  %s984_s3 = inlined_call_operand.hbm [shape: f32[2,256], index: 3, kind: output, shape index: {}]  }
   0x1   :  { %10 = vsyncpa [#allocation3 + $0x1], 0 }
   0x2   :  { %11 = vsyncpa [#allocation6], 0 }
   0x3   :  { %12 = vsyncpa [#allocation4], 0  ;;  %s865_s12 = smov 0   ;;  %s867_s13 = smov 0  }
   0x4   :  { %s869_s14 = smov 0   ;;  %s871_s15 = smov 0  }
   0x5 LB: > { %s884_s16 = sadd.s32 4294967295, %s835_s15   ;;  %p38_p0 = scmp.ne.s32.totalorder %s827_s13, %s823_s12  ;;  %s835_s15 = sphi %s871_s15, %s991_s15   ;;  %s831_s14 = sphi %s869_s14, %s990_s14   ;;  %s827_s13 = sphi %s867_s13, %s989_s13   ;;  %s823_s12 = sphi %s865_s12, %s988_s12  }
   0x6   : > { %p39_p1 = scmp.eq.s32.totalorder %s884_s16, 0  ;;  %p500_p2 = scmp.ge.s32.totalorder %s835_s15, 1 }
   0x7   : > { %p112_p3 = scmp.lt.s32.totalorder %s835_s15, 4  ;;  %p501_p4 = scmp.ne.s32.totalorder %s884_s16, 0 }
   0x8   : > { %p893_p5 = por %p39_p1, %p38_p0  ;;  %s123_s20 = sshll.u32 %s982_s1, 4  ;;  %s124_s20 = int_to_ptr.hbm [resolvable:$true] %s123_s20 }
   0x9   : > { %p900_p6 = pnand %p500_p2, %p112_p3  ;;  %s837_s22 = smov [#allocation5]  }
   0xa   : > { %s125_s23 = sshll.u32 %s837_s22, 4  ;;  %s138_s26 = sshll.u32 %s983_s2, 4  ;;  %s126_s23 = int_to_ptr.vmem [resolvable:$true] %s125_s23  ;;  %s139_s26 = int_to_ptr.hbm [resolvable:$true] %s138_s26 }
   0xb   : > { %p617_p7 = pneg %p900_p6  ;;  %s838_s27 = smov 128  }
   0xc   : > { %s839_s28 = smov 8   ;;  %s840_s29 = smov [#allocation7]  }
   0xd   : > { %p618_p8 = pnand %p617_p7, %p39_p1  ;;  %s140_s30 = sshll.u32 %s840_s29, 4  ;;  %s141_s30 = int_to_ptr.vmem [resolvable:$true] %s140_s30 }
   0xe   : > { %s912_s4 = sadd.s32 1, %s835_s15   ;;  %s25_s5 = sadd.s32 1, %s831_s14 }
   0xf   : > { %620 = dma.hbm_to_vmem [thread:$0]  (!%p618_p8), %s124_s20, 2048, %s126_s23, [#allocation6], %s838_s27, %s838_s27, %s839_s28  }
  0x10   : > { %623 = dma.hbm_to_vmem [thread:$0]  (!%p618_p8), %s139_s26, 32, %s141_s30, [#allocation6]  }
  0x11   : > { %s22_s6 = ssub.s32 %s835_s15, %s912_s4  ;;  %p32_p9 = scmp.ne.s32.totalorder %s831_s14, %s827_s13 }
  0x12   : > { %p23_p10 = scmp.eq.s32.totalorder %s22_s6, 0  ;;  %p33_p11 = scmp.eq.s32.totalorder %s835_s15, 0 }
  0x13   : > { %p630_p12 = scmp.lt.s32.totalorder %s835_s15, 3  ;;  %s151_s7 = sand.u32 1, %s831_s14  }
  0x14   : > { %s923_s8 = scalar_select %p23_p10, %s831_s14, %s25_s5  }
  0x15   : > { %p34_p13 = por %p33_p11, %p32_p9  ;;  %s504_s9 = sshll.u32 %s151_s7, 3 }
  0x16   : > { %s585_s10 = sshll.u32 %s835_s15, 3  ;;  %s155_s20 = scalar_lea.vmem [#allocation2], %s504_s9 }
  0x17   : > { %s160_s18 = scalar_lea.hbm %s981_s0, %s585_s10  ;;  %s163_s22 = sshll.u32 %s155_s20, 4  ;;  %s164_s22 = int_to_ptr.vmem [resolvable:$true] %s163_s22 }
  0x18   : > { %s161_s19 = sshll.u32 %s160_s18, 4  ;;  %p929_p0 = pnand %p630_p12, %p34_p13  ;;  %s162_s19 = int_to_ptr.hbm [resolvable:$true] %s161_s19 }
  0x19   : > { %s152_s24 = scalar_lea.sflag [#allocation3], %s151_s7  ;;  %s735_s25 = sshra.s32 %s162_s19, 4  ;;  %s736_s25 = int_to_ptr.hbm [resolvable:$true] %s735_s25 }
  0x1a   : > { %s737_s26 = scalar_lea.hbm %s736_s25, 8  ;;  %p739_p3 = pneg %p929_p0 }
  0x1b   : > { %p738_p2 = scmp.ne.s32.totalorder %s736_s25, %s737_s26  ;;  %s742_s28 = scalar_lea.hbm %s981_s0, 24 }
  0x1c   : > { %p743_p9 = scmp.lt.s32.totalorder %s736_s25, %s981_s0  ;;  %p744_p10 = scmp.lt.s32.totalorder %s742_s28, %s737_s26 }
  0x1d   : > { %p740_p7 = pnand %p739_p3, %p738_p2 }
  0x1e   : > { %p745_p11 = por %p744_p10, %p743_p9 }
  0x1f   : > { %p741_p8 = pneg %p740_p7 }
  0x21   : > { %p746_p12 = pnand %p745_p11, %p741_p8 }
  0x23   : > { %749 = shalt.err (!%p746_p12)
}
  0x24   : > { %s841_s5 = smov 64   ;;  %s842_s6 = smov 4  }
  0x25   : > { %627 = dma.hbm_to_vmem [thread:$0]  (!%p929_p0), %s162_s19, 128, %s164_s22, %s152_s24, %s841_s5, %s841_s5, %s842_s6  }
  0x26   : > { %175 = sbr.rel (%p900_p6) target bundleno = 250 (0xfa), region = 32  ;;  %s177_s7 = sand.u32 (!%p900_p6), 1, %s827_s13  }
  0x27   : > { %s946_s9 = sshll.u32 (!%p900_p6), %s177_s7, 3  ;;  %s178_s10 = scalar_lea.sflag (!%p900_p6), [#allocation3], %s177_s7 }
  0x28   : > { %s181_s11 = scalar_lea.vmem (!%p900_p6), [#allocation2], %s946_s9 }
  0x2b   : > { %810 = dma.done.wait (%p893_p5), %s178_s10, 128  }
  0x2c   : > { %812 = vsyncadd (%p893_p5), %s178_s10, 4294967168 }
  0x2d   : > { %814 = dma.done.wait (%p39_p1), [#allocation6], 2080  }
  0x2e   : > { %816 = vsyncadd (%p39_p1), [#allocation6], 4294965216  ;;  %214 = sbr.rel (%p501_p4) target bundleno = 53 (0x35), region = 48 }
  0x33   : > { %v843_v0 = vmov 0.0  }
  0x34   : > { %215 = vst [vmem:[#allocation8] sm:$0xf] %v843_v0 }
  0x35 PF: > { %v574_v1 = vld [vmem:[#allocation5 + $0x70] sm:$0xf]  ;;  %v602_v2 = vld [vmem:[#allocation5 + $0x74] sm:$0xf0]  ;;  %v601_v3 = vld [vmem:[#allocation5 + $0x74] sm:$0xf]  ;;  %v355_v50 = vlaneseq }
  0x36   : > { %v575_v4 = vor.u32 %v602_v2, %v574_v1  ;;  %v576_v5 = vld [vmem:[#allocation5 + $0x78] sm:$0xf0]  ;;  %v566_v6 = vld [vmem:[#allocation5 + $0x60] sm:$0xf]  ;;  %v600_v7 = vld [vmem:[#allocation5 + $0x64] sm:$0xf0] }
  0x37   : > { %v579_v8 = vor.u32 %v601_v3, %v576_v5  ;;  %v599_v9 = vld [vmem:[#allocation5 + $0x64] sm:$0xf]  ;;  %v568_v10 = vld [vmem:[#allocation5 + $0x68] sm:$0xf0]  ;;  %v567_v11 = vor.u32 %v600_v7, %v566_v6  ;;  %v558_v13 = vld [vmem:[#allocation5 + $0x50] sm:$0xf] }
  0x38   : > { %326 = vmatpush.bf16.msra.mxu0 %v575_v4  ;;  %v571_v12 = vor.u32 %v599_v9, %v568_v10  ;;  %v598_v14 = vld [vmem:[#allocation5 + $0x54] sm:$0xf0]  ;;  %v597_v15 = vld [vmem:[#allocation5 + $0x54] sm:$0xf]  ;;  %v560_v16 = vld [vmem:[#allocation5 + $0x58] sm:$0xf0] }
  0x39   : > { %340 = vmatpush.bf16.msra.mxu1 %v579_v8  ;;  %v559_v17 = vor.u32 %v598_v14, %v558_v13  ;;  %v563_v18 = vor.u32 %v597_v15, %v560_v16  ;;  %v550_v19 = vld [vmem:[#allocation5 + $0x40] sm:$0xf]  ;;  %v596_v20 = vld [vmem:[#allocation5 + $0x44] sm:$0xf0]  ;;  %v595_v21 = vld [vmem:[#allocation5 + $0x44] sm:$0xf] }
  0x3a   : > { %v552_v22 = vld [vmem:[#allocation5 + $0x48] sm:$0xf0]  ;;  %v551_v23 = vor.u32 %v596_v20, %v550_v19  ;;  %v542_v25 = vld [vmem:[#allocation5 + $0x30] sm:$0xf]  ;;  %v594_v26 = vld [vmem:[#allocation5 + $0x34] sm:$0xf0] }
  0x3b   : > { %v555_v24 = vor.u32 %v595_v21, %v552_v22  ;;  %v593_v27 = vld [vmem:[#allocation5 + $0x34] sm:$0xf]  ;;  %v544_v28 = vld [vmem:[#allocation5 + $0x38] sm:$0xf0]  ;;  %v543_v29 = vor.u32 %v594_v26, %v542_v25  ;;  %v534_v31 = vld [vmem:[#allocation5 + $0x20] sm:$0xf] }
  0x3c   : > { %327 = vmatpush.bf16.msra.mxu0 %v567_v11  ;;  %v547_v30 = vor.u32 %v593_v27, %v544_v28  ;;  %v592_v32 = vld [vmem:[#allocation5 + $0x24] sm:$0xf0]  ;;  %v591_v33 = vld [vmem:[#allocation5 + $0x24] sm:$0xf]  ;;  %v536_v34 = vld [vmem:[#allocation5 + $0x28] sm:$0xf0] }
  0x3d   : > { %341 = vmatpush.bf16.msra.mxu1 %v571_v12  ;;  %v535_v35 = vor.u32 %v592_v32, %v534_v31  ;;  %v539_v36 = vor.u32 %v591_v33, %v536_v34  ;;  %v526_v37 = vld [vmem:[#allocation5 + $0x10] sm:$0xf]  ;;  %v590_v38 = vld [vmem:[#allocation5 + $0x14] sm:$0xf0]  ;;  %v589_v39 = vld [vmem:[#allocation5 + $0x14] sm:$0xf] }
  0x3e   : > { %v528_v40 = vld [vmem:[#allocation5 + $0x18] sm:$0xf0]  ;;  %v527_v41 = vor.u32 %v590_v38, %v526_v37  ;;  %v518_v43 = vld [vmem:[#allocation5] sm:$0xf]  ;;  %v588_v44 = vld [vmem:[#allocation5 + $0x4] sm:$0xf0] }
  0x3f   : > { %v531_v42 = vor.u32 %v589_v39, %v528_v40  ;;  %v587_v45 = vld [vmem:[#allocation5 + $0x4] sm:$0xf]  ;;  %v520_v46 = vld [vmem:[#allocation5 + $0x8] sm:$0xf0]  ;;  %v519_v47 = vor.u32 %v588_v44, %v518_v43  ;;  %v586_v49 = vld [vmem:[%s181_s11] sm:$0xff]  ;;  %s580_s17 = sshll.u32 %s884_s16, 4 }
  0x40   : > { %328 = vmatpush.bf16.msra.mxu0 %v559_v17  ;;  %v523_v48 = vor.u32 %v587_v45, %v520_v46  ;;  %v356_v51 = vshrl.u32 %v355_v50, 7  ;;  %v234_v52 = vld [vmem:[#allocation7] sm:$0x3]  ;;  %v358_v54 = vstv %s580_s17  ;;  %vm385_vm2 = vcmask 1040384   ;;  %s844_s21 = smov [#allocation8]   ;;  %s429_s20 = sshll.u32 %s984_s3, 4  ;;  %s430_s20 = int_to_ptr.hbm [resolvable:$true] %s429_s20 }
  0x41   : > { %342 = vmatpush.bf16.msra.mxu1 %v563_v18  ;;  %v236_v56 = vperm.slane %v234_v52, 0  ;;  %v237_v58 = vperm.slane %v234_v52, 1  ;;  %v367_v39 = vld [vmem:[#allocation8] ss:$2 sm:$0x3]  ;;  %s427_s12 = sshll.u32 %s844_s21, 4  ;;  %s428_s12 = int_to_ptr.vmem [resolvable:$true] %s427_s12 }
  0x42   : > { %v357_v55 = vadd.s32 8, %v356_v51  ;;  %v359_v59 = vadd.s32 %v358_v54, %v356_v51  ;;  %vm391_vm3 = vcmp.lt.s32.totalorder %v355_v50, 256  ;;  %v395_v43 = vld [vmem:[#allocation8 + $0x1] ss:$2 sm:$0x3]  ;;  %p633_p1 = scmp.eq.s32.totalorder %s884_s16, 2 }
  0x44   : > { %329 = vmatpush.bf16.msra.mxu0 %v551_v23  ;;  %v360_v60 = vadd.s32 %v358_v54, %v357_v55  ;;  %vm361_vm0 = vcmp.lt.s32.totalorder %v359_v59, 40 }
  0x45   : > { %343 = vmatpush.bf16.msra.mxu1 %v555_v24 }
  0x46   : > { %vm362_vm1 = vcmp.lt.s32.totalorder %v360_v60, 40 }
  0x48   : > { %330 = vmatpush.bf16.msra.mxu0 %v543_v29 }
  0x49   : > { %344 = vmatpush.bf16.msra.mxu1 %v547_v30 }
  0x4c   : > { %331 = vmatpush.bf16.msra.mxu0 %v535_v35 }
  0x4d   : > { %345 = vmatpush.bf16.msra.mxu1 %v539_v36 }
  0x50   : > { %332 = vmatpush.bf16.msra.mxu0 %v527_v41 }
  0x51   : > { %346 = vmatpush.bf16.msra.mxu1 %v531_v42 }
  0x54   : > { %333 = vmatpush.bf16.msra.mxu0 %v519_v47 }
  0x55   : > { %347 = vmatpush.bf16.msra.mxu1 %v523_v48 }
  0x57   : > { %334 = vmatmul.bf16.vlgmr.msra.gmra.mxu0 %v586_v49 }
  0x58   : > { %348 = vmatmul.bf16.vlgmr.msra.gmra.mxu1 %v586_v49 }
  0xd4   : > { %v335_v53 = vpop.f32.mrf.mxu0 }
  0xd5   : > { %v349_v57 = vpop.f32.mrf.mxu1  ;;  %v336_v61 = vadd.f32 %v335_v53, %v236_v56 }
  0xd6   : > { %v350_v62 = vadd.f32 %v349_v57, %v237_v58 }
  0xd7   : > { %v363_v0 = vsel %vm361_vm0, %v336_v61, 0.0 }
  0xd8   : > { %v364_v3 = vsel %vm361_vm0, %v350_v62, 0.0  ;;  %v396_v6 = vmul.f32 %v363_v0, %v363_v0 }
  0xd9   : > { %v397_v10 = vmul.f32 %v364_v3, %v364_v3 }
  0xdc   : > { %v337_v63 = vpop.f32.mrf.mxu0 }
  0xdd   : > { %v338_v1 = vadd.f32 %v337_v63, %v236_v56  ;;  %v351_v2 = vpop.f32.mrf.mxu1 }
  0xde   : > { %v352_v4 = vadd.f32 %v351_v2, %v237_v58 }
  0xdf   : > { %v365_v5 = vsel %vm362_vm1, %v338_v1, 0.0 }
  0xe0   : > { %v368_v7 = vadd.f32 %v365_v5, %v363_v0  ;;  %v398_v8 = vmul.f32 %v365_v5, %v365_v5  ;;  %v366_v9 = vsel %vm362_vm1, %v352_v4, 0.0 }
  0xe1   : > { %v375_v11 = vadd.f32 %v366_v9, %v364_v3  ;;  %v399_v12 = vmul.f32 %v366_v9, %v366_v9 }
  0xe2   : > { %v369_v13 = vrot.slane %v368_v7, 4  ;;  %v400_v14 = vadd.f32 %v398_v8, %v396_v6 }
  0xe3   : > { %v376_v15 = vrot.slane %v375_v11, 4  ;;  %v407_v16 = vadd.f32 %v399_v12, %v397_v10 }
  0xe4   : > { %v370_v17 = vadd.f32 %v369_v13, %v368_v7  ;;  %v401_v18 = vrot.slane %v400_v14, 4 }
  0xe5   : > { %v377_v19 = vadd.f32 %v376_v15, %v375_v11  ;;  %v408_v20 = vrot.slane %v407_v16, 4 }
  0xe6   : > { %v371_v21 = vrot.slane %v370_v17, 2  ;;  %v402_v22 = vadd.f32 %v401_v18, %v400_v14 }
  0xe7   : > { %v378_v23 = vrot.slane %v377_v19, 2  ;;  %v409_v24 = vadd.f32 %v408_v20, %v407_v16 }
  0xe8   : > { %v372_v25 = vadd.f32 %v371_v21, %v370_v17  ;;  %v403_v26 = vrot.slane %v402_v22, 2 }
  0xe9   : > { %v379_v27 = vadd.f32 %v378_v23, %v377_v19  ;;  %v410_v28 = vrot.slane %v409_v24, 2 }
  0xea   : > { %v404_v29 = vadd.f32 %v403_v26, %v402_v22  ;;  %v373_v30 = vrot.slane %v372_v25, 1 }
  0xeb   : > { %v380_v31 = vrot.slane %v379_v27, 1  ;;  %v411_v32 = vadd.f32 %v410_v28, %v409_v24 }
  0xec   : > { %v405_v33 = vrot.slane %v404_v29, 1  ;;  %v374_v36 = vadd.f32 %v373_v30, %v372_v25 }
  0xed   : > { %v381_v34 = vadd.f32 %v380_v31, %v379_v27  ;;  %v412_v35 = vrot.slane %v411_v32, 1 }
  0xee   : > { %v406_v40 = vadd.f32 %v405_v33, %v404_v29 }
  0xef   : > { %v384_v37 = vrot.slane %v381_v34, 7  ;;  %v413_v38 = vadd.f32 %v412_v35, %v411_v32 }
  0xf1   : > { %v416_v41 = vrot.slane %v413_v38, 7  ;;  %v386_v42 = vsel %vm385_vm2, %v374_v36, %v384_v37 }
  0xf2   : > { %v388_v44 = vadd.f32 %v386_v42, %v367_v39 }
  0xf3   : > { %v417_v45 = vsel %vm385_vm2, %v406_v40, %v416_v41 }
  0xf4   : > { %393 = vst.msk [vmem:[#allocation8] ss:$2 sm:$0x3] %vm391_vm3, %v388_v44  ;;  %v419_v46 = vadd.f32 %v417_v45, %v395_v43 }
  0xf6   : > { %420 = vst.msk [vmem:[#allocation8 + $0x1] ss:$2 sm:$0x3] %vm391_vm3, %v419_v46 }
  0xf7   : > { %614 = dma.vmem_to_hbm [thread:$0]  (%p633_p1), %s428_s12, 64, %s430_s20, [#allocation4]  }
  0xf8   : > { %818 = dma.done.wait (%p633_p1), [#allocation4], 64  }
  0xf9   : > { %820 = vsyncadd (%p633_p1), [#allocation4], 4294967232 }
  0xfa PF: > { %p15_p4 = scmp.ge.s32.totalorder %s912_s4, 5   ;;  %s988_s12 = smov %s827_s13 }
  0xfb   : > { %s989_s13 = smov %s831_s14  ;;  %s990_s14 = smov %s923_s8 }
  0xfc   : > { %s991_s15 = smov %s912_s4  ;;  %17 = sbr.rel (!%p15_p4) target bundleno = 5 (0x5), region = 82 }
 0x101   :  { %443 = vsyncpa [#allocation3], 1 }
 0x102   :  { %445 = vsyncpa [#allocation3 + $0x1], 1 }
 0x103   :  { %446 = vsyncpa [#allocation6], 1 }
 0x104   :  { %447 = vsyncpa [#allocation4], 1 }
 0x105   :  { %449 = vsyncpa [#allocation4 + $0x1], 1 }

</bundles_post_ra>
